<compile_context>
chip_gen: v7x
topology: tpu7x:2x2x1
jax: 0.10.0
libtpu: 0.0.40
codegen_flags: <defaults>
</compile_context>

<pallas_src>
import math
from functools import partial

import jax
import jax.numpy as jnp
from jax import lax
from jax.experimental import pallas as pl
from jax.experimental.pallas import tpu as pltpu

_INV_SQRT2 = 0.7071067811865476


def _gelu_exact(x):
    # PyTorch F.gelu default: exact erf formulation.
    return 0.5 * x * (1.0 + lax.erf(x * _INV_SQRT2))


def _block_diag(w, pack):
    """(k, n) -> (pack*k, pack*n) block-diagonal replication."""
    if pack == 1:
        return w
    k, n = w.shape
    eye = jnp.eye(pack, dtype=w.dtype)
    return (eye[:, None, :, None] * w[None, :, None, :]).reshape(pack * k, pack * n)


def _ffn_kernel(x_ref, w1_ref, b1_ref, w2_ref, b2_ref, o_ref, *, ph):
    # x_ref:  (tm_slab, pack*dim)        -- `pack` tokens per lane-dense row, f32
    # w1_ref: (pack*dim, 2*pack*hidden)  -- block-diag W1, [value bands | gate bands], bf16
    # b1_ref: (1, 2*pack*hidden)         -- f32, same column ordering as W1
    # w2_ref: (pack*hidden, pack*dim)    -- block-diag W2, bf16
    # b2_ref: (1, pack*dim)              -- f32
    # ph = pack * hidden
    x = x_ref[...].astype(jnp.bfloat16)

    # First linear: f32 accumulation on the MXU, bias added in f32.
    h = jnp.dot(x, w1_ref[...], preferred_element_type=jnp.float32) + b1_ref[...]

    # GEGLU: value half / gate half are contiguous 128-lane-aligned slabs.
    a = h[:, :ph]
    g = h[:, ph:]
    z = a * _gelu_exact(g)                                     # (tm_slab, pack*hidden) f32

    y = jnp.dot(z.astype(jnp.bfloat16), w2_ref[...],
                preferred_element_type=jnp.float32) + b2_ref[...]
    o_ref[...] = y.astype(o_ref.dtype)                         # full-width store


def _pack_params(w1, b1, w2, b2, pack, hidden):
    """Build block-diagonal, value/gate-regrouped packed weights (weights in bf16)."""
    w1v = _block_diag(w1[:, :hidden], pack)                    # (pack*dim, pack*hidden)
    w1g = _block_diag(w1[:, hidden:], pack)                    # (pack*dim, pack*hidden)
    w1p = jnp.concatenate([w1v, w1g], axis=1).astype(jnp.bfloat16)
    b1v = jnp.tile(b1[:, :hidden], (1, pack))
    b1g = jnp.tile(b1[:, hidden:], (1, pack))
    b1p = jnp.concatenate([b1v, b1g], axis=1).astype(jnp.float32)
    w2p = _block_diag(w2, pack).astype(jnp.bfloat16)           # (pack*hidden, pack*dim)
    b2p = jnp.tile(b2, (1, pack)).astype(jnp.float32)          # (1, pack*dim)
    return w1p, b1p, w2p, b2p


def feed_forward(x, w1, b1, w2, b2, *, tile_tokens=2048):
    """x: (..., dim). w1: (dim, 2*hidden), b1: (1, 2*hidden), w2: (hidden, dim),
    b2: (1, dim). Returns same shape/dtype as x."""
    orig_shape = x.shape
    dim = orig_shape[-1]
    two_hidden = w1.shape[1]
    hidden = two_hidden // 2

    x2d = x.reshape(-1, dim)
    M = x2d.shape[0]

    # Pack `pack` tokens per 128-lane row when dim divides 128 (lane-dense I/O).
    pack = 128 // dim if (dim < 128 and 128 % dim == 0) else 1
    lane_w = dim * pack

    # Tile sizing: multiples of one (8, lane_w) block; padded tail via cdiv.
    min_tokens = pack * 8
    tile_tokens = max(min_tokens, (int(tile_tokens) // min_tokens) * min_tokens)
    tile_tokens = min(tile_tokens, pl.cdiv(M, min_tokens) * min_tokens)
    m_pad = pl.cdiv(M, tile_tokens) * tile_tokens
    if m_pad != M:
        x2d = jnp.pad(x2d, ((0, m_pad - M), (0, 0)))

    # Contiguous reshape: `pack` tokens per 128-lane slab row. Free in HBM.
    x_slab = x2d.reshape(m_pad // pack, lane_w)
    tm_slab = tile_tokens // pack
    grid = (m_pad // tile_tokens,)

    w1p, b1p, w2p, b2p = _pack_params(w1, b1, w2, b2, pack, hidden)
    ph = pack * hidden

    out_slab = pl.pallas_call(
        partial(_ffn_kernel, ph=ph),
        out_shape=jax.ShapeDtypeStruct((m_pad // pack, lane_w), x.dtype),
        grid_spec=pltpu.PrefetchScalarGridSpec(
            num_scalar_prefetch=0,
            grid=grid,
            in_specs=[
                pl.BlockSpec((tm_slab, lane_w), lambda i: (i, 0)),       # x slab
                pl.BlockSpec((lane_w, 2 * ph), lambda i: (0, 0)),        # W1 (bf16)
                pl.BlockSpec((1, 2 * ph), lambda i: (0, 0)),             # b1 (f32)
                pl.BlockSpec((ph, lane_w), lambda i: (0, 0)),            # W2 (bf16)
                pl.BlockSpec((1, lane_w), lambda i: (0, 0)),             # b2 (f32)
            ],
            out_specs=pl.BlockSpec((tm_slab, lane_w), lambda i: (i, 0)),
        ),
        compiler_params=pltpu.CompilerParams(
            dimension_semantics=("parallel",)),
    )(x_slab, w1p, b1p, w2p, b2p)

    out = out_slab.reshape(m_pad, dim)[:M]
    return out.reshape(orig_shape)


def init_feed_forward_params(key, dim, mult=4, dtype=jnp.float32):
    """Deterministic init mimicking nn.Linear's uniform(-1/sqrt(fan_in), ...)."""
    hidden = dim * mult
    k1, k2, k3, k4 = jax.random.split(key, 4)
    bound1 = 1.0 / math.sqrt(dim)
    bound2 = 1.0 / math.sqrt(hidden)
    # Stored already transposed to (in, out) so the kernel does x @ W.
    w1 = jax.random.uniform(k1, (dim, hidden * 2), dtype, -bound1, bound1)
    b1 = jax.random.uniform(k2, (1, hidden * 2), dtype, -bound1, bound1)
    w2 = jax.random.uniform(k3, (hidden, dim), dtype, -bound2, bound2)
    b2 = jax.random.uniform(k4, (1, dim), dtype, -bound2, bound2)
    return w1, b1, w2, b2


def feed_forward_ref(x, w1, b1, w2, b2):
    """Pure-JAX f32 reference with identical semantics (for sanity check)."""
    h = x @ w1 + b1[0]
    hidden = w2.shape[0]
    a, g = h[..., :hidden], h[..., hidden:]
    z = a * (0.5 * g * (1.0 + lax.erf(g * _INV_SQRT2)))
    return z @ w2 + b2[0]


if __name__ == "__main__":
    batch, seq, dim, mult = 2, 8, 32, 4

    key = jax.random.PRNGKey(0)
    kx, kp = jax.random.split(key)
    x = jax.random.normal(kx, (batch, seq, dim), jnp.float32)
    w1, b1, w2, b2 = init_feed_forward_params(kp, dim, mult)

    y = jax.block_until_ready(feed_forward(x, w1, b1, w2, b2))
    y_ref = feed_forward_ref(x, w1, b1, w2, b2)
    assert y.shape == x.shape
    # bf16 MXU operands (f32 accumulation) -> loosened tolerance vs f32 reference.
    assert jnp.allclose(y, y_ref, atol=2e-2, rtol=2e-2), "mismatch vs reference"

    # Second case: exercises multi-step grid and the padded-tail path.
    x2 = jax.random.normal(jax.random.PRNGKey(1), (3, 70, dim), jnp.float32)
    y2 = jax.block_until_ready(feed_forward(x2, w1, b1, w2, b2, tile_tokens=128))
    y2_ref = feed_forward_ref(x2, w1, b1, w2, b2)
    assert jnp.allclose(y2, y2_ref, atol=2e-2, rtol=2e-2), "mismatch vs reference (tail)"

    print("KERNEL_OK")
</pallas_src>

<mosaic_0001>
module attributes {stable_mosaic.version = 11 : i64} {
  func.func @_ffn_kernel(%arg0: i32, %arg1: memref<8x128xf32, #tpu.memory_space<vmem>>, %arg2: memref<128x1024xbf16, #tpu.memory_space<vmem>>, %arg3: memref<1x1024xf32, #tpu.memory_space<vmem>>, %arg4: memref<512x128xbf16, #tpu.memory_space<vmem>>, %arg5: memref<1x128xf32, #tpu.memory_space<vmem>>, %arg6: memref<8x128xf32, #tpu.memory_space<vmem>>) attributes {dimension_semantics = [#tpu.dimension_semantics<parallel>], iteration_bounds = array<i64: 1>, scalar_prefetch = 0 : i64, scratch_operands = 0 : i64, tpu.core_type = #tpu.core_type<tc>, window_params = [{transform_indices = @transform_0, window_bounds = array<i64: 8, 128>}, {pipeline_mode = #tpu.pipeline_mode<synchronous>, transform_indices = @transform_1, window_bounds = array<i64: 128, 1024>}, {pipeline_mode = #tpu.pipeline_mode<synchronous>, transform_indices = @transform_2, window_bounds = array<i64: 1, 1024>}, {pipeline_mode = #tpu.pipeline_mode<synchronous>, transform_indices = @transform_3, window_bounds = array<i64: 512, 128>}, {pipeline_mode = #tpu.pipeline_mode<synchronous>, transform_indices = @transform_4, window_bounds = array<i64: 1, 128>}, {transform_indices = @transform_5, window_bounds = array<i64: 8, 128>}]} {
    %c0 = arith.constant 0 : index
    %c0_0 = arith.constant 0 : index
    %0 = vector.load %arg1[%c0, %c0_0] : memref<8x128xf32, #tpu.memory_space<vmem>>, vector<8x128xf32>
    %1 = arith.truncf %0 : vector<8x128xf32> to vector<8x128xbf16>
    %c0_1 = arith.constant 0 : index
    %c0_2 = arith.constant 0 : index
    %2 = vector.load %arg2[%c0_1, %c0_2] : memref<128x1024xbf16, #tpu.memory_space<vmem>>, vector<128x1024xbf16>
    %cst = arith.constant dense<0.000000e+00> : vector<8x1024xf32>
    %3 = tpu.matmul %1, %2, %cst {dimension_numbers = #tpu.dot_dimension_numbers<[1], [0], [0], [1], [0, 0, 1, 1], [], []>} : vector<8x128xbf16>, vector<128x1024xbf16>, vector<8x1024xf32> -> vector<8x1024xf32>
    %c0_3 = arith.constant 0 : index
    %c0_4 = arith.constant 0 : index
    %4 = vector.load %arg3[%c0_3, %c0_4] : memref<1x1024xf32, #tpu.memory_space<vmem>>, vector<1x1024xf32>
    %5 = vector.broadcast %4 : vector<1x1024xf32> to vector<8x1024xf32>
    %6 = arith.addf %3, %5 : vector<8x1024xf32>
    %7 = vector.extract_strided_slice %6 {offsets = [0, 0], sizes = [8, 512], strides = [1, 1]} : vector<8x1024xf32> to vector<8x512xf32>
    %8 = vector.extract_strided_slice %6 {offsets = [0, 512], sizes = [8, 512], strides = [1, 1]} : vector<8x1024xf32> to vector<8x512xf32>
    %cst_5 = arith.constant 5.000000e-01 : f32
    %9 = vector.broadcast %cst_5 : f32 to vector<8x512xf32>
    %10 = arith.mulf %9, %8 : vector<8x512xf32>
    %cst_6 = arith.constant 0.707106769 : f32
    %11 = vector.broadcast %cst_6 : f32 to vector<8x512xf32>
    %12 = arith.mulf %8, %11 : vector<8x512xf32>
    %13 = math.erf %12 : vector<8x512xf32>
    %cst_7 = arith.constant 1.000000e+00 : f32
    %14 = vector.broadcast %cst_7 : f32 to vector<8x512xf32>
    %15 = arith.addf %14, %13 : vector<8x512xf32>
    %16 = arith.mulf %10, %15 : vector<8x512xf32>
    %17 = arith.mulf %7, %16 : vector<8x512xf32>
    %18 = arith.truncf %17 : vector<8x512xf32> to vector<8x512xbf16>
    %c0_8 = arith.constant 0 : index
    %c0_9 = arith.constant 0 : index
    %19 = vector.load %arg4[%c0_8, %c0_9] : memref<512x128xbf16, #tpu.memory_space<vmem>>, vector<512x128xbf16>
    %cst_10 = arith.constant dense<0.000000e+00> : vector<8x128xf32>
    %20 = tpu.matmul %18, %19, %cst_10 {dimension_numbers = #tpu.dot_dimension_numbers<[1], [0], [0], [1], [0, 0, 1, 1], [], []>} : vector<8x512xbf16>, vector<512x128xbf16>, vector<8x128xf32> -> vector<8x128xf32>
    %c0_11 = arith.constant 0 : index
    %c0_12 = arith.constant 0 : index
    %21 = vector.load %arg5[%c0_11, %c0_12] : memref<1x128xf32, #tpu.memory_space<vmem>>, vector<1x128xf32>
    %22 = vector.broadcast %21 : vector<1x128xf32> to vector<8x128xf32>
    %23 = arith.addf %20, %22 : vector<8x128xf32>
    %c0_13 = arith.constant 0 : index
    %c0_14 = arith.constant 0 : index
    %24 = vector.load %arg6[%c0_13, %c0_14] : memref<8x128xf32, #tpu.memory_space<vmem>>, vector<8x128xf32>
    tpu.vector_store %arg6[%c0_13, %c0_14], %23 {strides = array<i32>} : memref<8x128xf32, #tpu.memory_space<vmem>>, vector<8x128xf32>,
    return
  }
  func.func @transform_0(%arg0: i32) -> (i32, i32) {
    %c0_i32 = arith.constant 0 : i32
    %c0_i32_0 = arith.constant 0 : i32
    return %arg0, %c0_i32 : i32, i32
  }
  func.func @transform_1(%arg0: i32) -> (i32, i32) {
    %c0_i32 = arith.constant 0 : i32
    %c0_i32_0 = arith.constant 0 : i32
    %c0_i32_1 = arith.constant 0 : i32
    return %c0_i32, %c0_i32_0 : i32, i32
  }
  func.func @transform_2(%arg0: i32) -> (i32, i32) {
    %c0_i32 = arith.constant 0 : i32
    %c0_i32_0 = arith.constant 0 : i32
    %c0_i32_1 = arith.constant 0 : i32
    return %c0_i32, %c0_i32_0 : i32, i32
  }
  func.func @transform_3(%arg0: i32) -> (i32, i32) {
    %c0_i32 = arith.constant 0 : i32
    %c0_i32_0 = arith.constant 0 : i32
    %c0_i32_1 = arith.constant 0 : i32
    return %c0_i32, %c0_i32_0 : i32, i32
  }
  func.func @transform_4(%arg0: i32) -> (i32, i32) {
    %c0_i32 = arith.constant 0 : i32
    %c0_i32_0 = arith.constant 0 : i32
    %c0_i32_1 = arith.constant 0 : i32
    return %c0_i32, %c0_i32_0 : i32, i32
  }
  func.func @transform_5(%arg0: i32) -> (i32, i32) {
    %c0_i32 = arith.constant 0 : i32
    %c0_i32_0 = arith.constant 0 : i32
    return %arg0, %c0_i32 : i32, i32
  }
}

</mosaic_0001>

<bundles_post_ra>
// kernel: tpu_custom_call.1
= control target key start
LH: loop header
LB: loop body
LE: loop exit
PB: predicated region body
PF: predicated region fallthrough
CT: control target
= control target key end

     0   :  { %10 = vsyncpa [#allocation3], 0  ;;  %s1479_s0 = inlined_call_operand.hbm [shape: f32[8,128], index: 0, kind: input, shape index: {}]   ;;  %s1480_s1 = inlined_call_operand.hbm [shape: bf16[128,1024], index: 1, kind: input, shape index: {}]   ;;  %s1481_s2 = inlined_call_operand.hbm [shape: f32[1,1024], index: 2, kind: input, shape index: {}]   ;;  %s1482_s3 = inlined_call_operand.hbm [shape: bf16[512,128], index: 3, kind: input, shape index: {}]   ;;  %s1483_s4 = inlined_call_operand.vmem [shape: f32[1,128], index: 4, kind: input, shape index: {}]   ;;  %s1484_s5 = inlined_call_operand.hbm [shape: f32[8,128], index: 5, kind: output, shape index: {}]  }
   0x1   :  { %11 = vsyncpa [#allocation6], 0 }
   0x2   :  { %12 = vsyncpa [#allocation9], 0 }
   0x3   :  { %13 = vsyncpa [#allocation4], 0  ;;  %s1363_s18 = smov [#allocation5]   ;;  %s1245_s22 = scalar_lea.hbm %s1480_s1, 8192 }
   0x4   :  { %s29_s19 = sshll.u32 %s1363_s18, 4  ;;  %p1246_p0 = scmp.ne.s32.totalorder %s1480_s1, %s1245_s22  ;;  %s30_s19 = int_to_ptr.vmem [resolvable:$true] %s29_s19 }
   0x5   :  { %p1249_p1 = scmp.lt.u32.totalorder %s1245_s22, %s1480_s1 }
   0x7   :  { %p1251_p2 = pnand %p1249_p1, %p1246_p0 }
   0x9   :  { %1254 = shalt.err (!%p1251_p2)
}
   0xa   :  { %s1255_s27 = scalar_lea.vmem %s30_s19, 8192  ;;  %p1260_p4 = scmp.lt.s32.totalorder %s30_s19, %s30_s19 }
   0xb   :  { %p1256_p3 = scmp.ne.s32.totalorder %s30_s19, %s1255_s27  ;;  %p1261_p5 = scmp.lt.s32.totalorder %s1255_s27, %s1255_s27 }
   0xd   :  { %p1262_p6 = por %p1261_p5, %p1260_p4 }
   0xf   :  { %p1263_p7 = pnand %p1262_p6, %p1256_p3 }
  0x11   :  { %1266 = shalt.err (!%p1263_p7)
}
  0x12   :  { %s1364_s28 = smov 512   ;;  %s1365_s29 = smov 32  }
  0x13   :  { %35 = dma.hbm_to_vmem [thread:$0]  %s1480_s1, 8192, %s30_s19, [#allocation6], %s1364_s28, %s1364_s28, %s1365_s29  }
  0x14   :  { %s1366_s7 = smov [#allocation2]   ;;  %s1367_s9 = smov [#allocation7]  }
  0x15   :  { %s20_s8 = sshll.u32 %s1366_s7, 4  ;;  %s42_s10 = sshll.u32 %s1367_s9, 4  ;;  %s21_s8 = int_to_ptr.vmem [resolvable:$true] %s20_s8  ;;  %s43_s10 = int_to_ptr.vmem [resolvable:$true] %s42_s10 }
  0x16   :  { %s1267_s13 = scalar_lea.hbm %s1479_s0, 128 }
  0x17   :  { %p1268_p8 = scmp.ne.s32.totalorder %s1479_s0, %s1267_s13  ;;  %p1271_p9 = scmp.lt.u32.totalorder %s1267_s13, %s1479_s0 }
  0x19   :  { %p1273_p10 = pnand %p1271_p9, %p1268_p8 }
  0x1b   :  { %1276 = shalt.err (!%p1273_p10)
}
  0x1c   :  { %s1277_s1 = scalar_lea.vmem %s21_s8, 128  ;;  %p1282_p12 = scmp.lt.s32.totalorder %s21_s8, %s21_s8 }
  0x1d   :  { %p1278_p11 = scmp.ne.s32.totalorder %s21_s8, %s1277_s1  ;;  %p1283_p13 = scmp.lt.s32.totalorder %s1277_s1, %s1277_s1 }
  0x1f   :  { %p1284_p0 = por %p1283_p13, %p1282_p12 }
  0x21   :  { %p1285_p1 = pnand %p1284_p0, %p1278_p11 }
  0x23   :  { %1288 = shalt.err (!%p1285_p1)
}
  0x24   :  { %23 = dma.hbm_to_vmem [thread:$0]  %s1479_s0, 128, %s21_s8, [#allocation3]  }
  0x25   :  { %s1289_s22 = scalar_lea.hbm %s1481_s2, 128 }
  0x26   :  { %p1290_p2 = scmp.ne.s32.totalorder %s1481_s2, %s1289_s22  ;;  %p1293_p3 = scmp.lt.u32.totalorder %s1289_s22, %s1481_s2 }
  0x28   :  { %p1295_p4 = pnand %p1293_p3, %p1290_p2 }
  0x2a   :  { %1298 = shalt.err (!%p1295_p4)
}
  0x2b   :  { %s1299_s27 = scalar_lea.vmem %s43_s10, 128  ;;  %p1304_p6 = scmp.lt.s32.totalorder %s43_s10, %s43_s10 }
  0x2c   :  { %p1300_p5 = scmp.ne.s32.totalorder %s43_s10, %s1299_s27  ;;  %p1305_p7 = scmp.lt.s32.totalorder %s1299_s27, %s1299_s27 }
  0x2e   :  { %p1306_p8 = por %p1305_p7, %p1304_p6 }
  0x30   :  { %p1307_p9 = pnand %p1306_p8, %p1300_p5 }
  0x32   :  { %1310 = shalt.err (!%p1307_p9)
}
  0x33   :  { %45 = dma.hbm_to_vmem [thread:$0]  %s1481_s2, 128, %s43_s10, [#allocation6]  }
  0x34   :  { %s1368_s29 = smov [#allocation8]   ;;  %s1311_s8 = scalar_lea.hbm %s1482_s3, 4096 }
  0x35   :  { %s51_s30 = sshll.u32 %s1368_s29, 4  ;;  %p1312_p10 = scmp.ne.s32.totalorder %s1482_s3, %s1311_s8  ;;  %s52_s30 = int_to_ptr.vmem [resolvable:$true] %s51_s30 }
  0x36   :  { %p1315_p11 = scmp.lt.u32.totalorder %s1311_s8, %s1482_s3 }
  0x38   :  { %p1317_p12 = pnand %p1315_p11, %p1312_p10 }
  0x3a   :  { %1320 = shalt.err (!%p1317_p12)
}
  0x3b   :  { %s1321_s14 = scalar_lea.vmem %s52_s30, 4096  ;;  %p1326_p0 = scmp.lt.s32.totalorder %s52_s30, %s52_s30 }
  0x3c   :  { %p1322_p13 = scmp.ne.s32.totalorder %s52_s30, %s1321_s14  ;;  %p1327_p1 = scmp.lt.s32.totalorder %s1321_s14, %s1321_s14 }
  0x3e   :  { %p1328_p2 = por %p1327_p1, %p1326_p0 }
  0x40   :  { %p1329_p3 = pnand %p1328_p2, %p1322_p13 }
  0x42   :  { %1332 = shalt.err (!%p1329_p3)
}
  0x43   :  { %s1369_s2 = smov 64   ;;  %s1370_s10 = smov 4  }
  0x44   :  { %57 = dma.hbm_to_vmem [thread:$0]  %s1482_s3, 4096, %s52_s30, [#allocation9], %s1369_s2, %s1369_s2, %s1370_s10  }
  0x45   :  { %1355 = dma.done.wait [#allocation3], 128  }
  0x46   :  { %1356 = vsyncadd [#allocation3], 4294967168 }
  0x47   :  { %1357 = dma.done.wait [#allocation6], 8320  }
  0x48   :  { %1358 = vsyncadd [#allocation6], 4294958976 }
  0x49   :  { %1359 = dma.done.wait [#allocation9], 4096  }
  0x4a   :  { %1360 = vsyncadd [#allocation9], 4294963200  ;;  %v1371_v0 = vmov 0   ;;  %v75_v1 = vld [vmem:[#allocation5] sm:$0xff]  ;;  %v76_v3 = vld [vmem:[#allocation5 + $0x8] sm:$0xff]  ;;  %s1372_s1 = smov [#allocation10]  }
  0x4b   :  { %533 = vmatprep.mubr.bf16.mxu0 %v1371_v0  ;;  %574 = vmatprep.mubr.bf16.mxu1 %v1371_v0  ;;  %v79_v2 = vld [vmem:[#allocation5 + $0x20] sm:$0xff]  ;;  %v80_v5 = vld [vmem:[#allocation5 + $0x28] sm:$0xff]  ;;  %v77_v60 = vld [vmem:[#allocation5 + $0x10] sm:$0xff]  ;;  %s1043_s18 = sshll.u32 %s1372_s1, 4  ;;  %s1044_s18 = int_to_ptr.vmem [resolvable:$true] %s1043_s18 }
  0x4c   :  { %v1055_v4 = vcombine.high %v75_v1, %v79_v2  ;;  %v1054_v6 = vcombine.low %v75_v1, %v79_v2  ;;  %v83_v7 = vld [vmem:[#allocation5 + $0x40] sm:$0xff]  ;;  %v1057_v9 = vcombine.high %v76_v3, %v80_v5  ;;  %v1056_v10 = vcombine.low %v76_v3, %v80_v5  ;;  %v84_v12 = vld [vmem:[#allocation5 + $0x48] sm:$0xff]  ;;  %v81_v61 = vld [vmem:[#allocation5 + $0x30] sm:$0xff]  ;;  %s1333_s19 = scalar_lea.vmem %s1044_s18, 128  ;;  %p1338_p5 = scmp.lt.s32.totalorder %s1044_s18, %s1044_s18 }
  0x4d   :  { %v87_v8 = vld [vmem:[#allocation5 + $0x60] sm:$0xff]  ;;  %v88_v13 = vld [vmem:[#allocation5 + $0x68] sm:$0xff]  ;;  %v78_v1 = vld [vmem:[#allocation5 + $0x18] sm:$0xff]  ;;  %p1334_p4 = scmp.ne.s32.totalorder %s1044_s18, %s1333_s19  ;;  %p1339_p6 = scmp.lt.s32.totalorder %s1333_s19, %s1333_s19 }
  0x4e   :  { %v1063_v11 = vcombine.high %v83_v7, %v87_v8  ;;  %v91_v14 = vld [vmem:[#allocation5 + $0x80] sm:$0xff]  ;;  %501 = vmatprep.subr.bf16.mxu0 %v1055_v4  ;;  %v1065_v15 = vcombine.high %v84_v12, %v88_v13  ;;  %v92_v17 = vld [vmem:[#allocation5 + $0x88] sm:$0xff]  ;;  %542 = vmatprep.subr.bf16.mxu1 %v1057_v9  ;;  %v1062_v19 = vcombine.low %v83_v7, %v87_v8  ;;  %v82_v2 = vld [vmem:[#allocation5 + $0x38] sm:$0xff] }
  0x4f   :  { %v95_v16 = vld [vmem:[#allocation5 + $0xa0] sm:$0xff]  ;;  %v96_v18 = vld [vmem:[#allocation5 + $0xa8] sm:$0xff]  ;;  %502 = vmatpush1.bf16.msra.mxu0 %v1054_v6  ;;  %543 = vmatpush1.bf16.msra.mxu1 %v1056_v10  ;;  %v1064_v20 = vcombine.low %v84_v12, %v88_v13  ;;  %v73_v4 = vld [vmem:[#allocation2] sm:$0xff]  ;;  %v1059_v9 = vcombine.high %v77_v60, %v81_v61  ;;  %v1061_v12 = vcombine.high %v78_v1, %v82_v2  ;;  %p1340_p7 = por %p1339_p6, %p1338_p5 }
  0x50   :  { %503 = vmatprep.subr.bf16.mxu0 %v1063_v11  ;;  %v1071_v21 = vcombine.high %v91_v14, %v95_v16  ;;  %544 = vmatprep.subr.bf16.mxu1 %v1065_v15  ;;  %v1073_v22 = vcombine.high %v92_v17, %v96_v18  ;;  %v99_v23 = vld [vmem:[#allocation5 + $0xc0] sm:$0xff]  ;;  %v100_v25 = vld [vmem:[#allocation5 + $0xc8] sm:$0xff]  ;;  %v1070_v27 = vcombine.low %v91_v14, %v95_v16  ;;  %v85_v6 = vld [vmem:[#allocation5 + $0x50] sm:$0xff] }
  0x51   :  { %v103_v24 = vld [vmem:[#allocation5 + $0xe0] sm:$0xff]  ;;  %v104_v26 = vld [vmem:[#allocation5 + $0xe8] sm:$0xff]  ;;  %v1072_v28 = vcombine.low %v92_v17, %v96_v18  ;;  %v89_v7 = vld [vmem:[#allocation5 + $0x70] sm:$0xff]  ;;  %v1453_v13 = vpack.c.bf16 %v73_v4, %v73_v4  ;;  %v1058_v14 = vcombine.low %v77_v60, %v81_v61  ;;  %v1060_v17 = vcombine.low %v78_v1, %v82_v2  ;;  %p1341_p8 = pnand %p1340_p7, %p1334_p4 }
  0x52   :  { %v1079_v29 = vcombine.high %v99_v23, %v103_v24  ;;  %v1081_v30 = vcombine.high %v100_v25, %v104_v26  ;;  %v107_v31 = vld [vmem:[#allocation5 + $0x100] sm:$0xff]  ;;  %v108_v33 = vld [vmem:[#allocation5 + $0x108] sm:$0xff]  ;;  %v1078_v35 = vcombine.low %v99_v23, %v103_v24  ;;  %v1080_v36 = vcombine.low %v100_v25, %v104_v26  ;;  %v86_v10 = vld [vmem:[#allocation5 + $0x58] sm:$0xff] }
  0x53   :  { %504 = vmatpush1.bf16.msra.mxu0 %v1062_v19  ;;  %545 = vmatpush1.bf16.msra.mxu1 %v1064_v20  ;;  %v111_v32 = vld [vmem:[#allocation5 + $0x120] sm:$0xff]  ;;  %v112_v34 = vld [vmem:[#allocation5 + $0x128] sm:$0xff]  ;;  %v90_v11 = vld [vmem:[#allocation5 + $0x78] sm:$0xff]  ;;  %v1067_v18 = vcombine.high %v85_v6, %v89_v7 }
  0x54   :  { %505 = vmatprep.subr.bf16.mxu0 %v1071_v21  ;;  %546 = vmatprep.subr.bf16.mxu1 %v1073_v22  ;;  %v1087_v37 = vcombine.high %v107_v31, %v111_v32  ;;  %v1089_v38 = vcombine.high %v108_v33, %v112_v34  ;;  %v115_v39 = vld [vmem:[#allocation5 + $0x140] sm:$0xff]  ;;  %v116_v41 = vld [vmem:[#allocation5 + $0x148] sm:$0xff]  ;;  %v1086_v43 = vcombine.low %v107_v31, %v111_v32  ;;  %v93_v15 = vld [vmem:[#allocation5 + $0x90] sm:$0xff] }
  0x55   :  { %v119_v40 = vld [vmem:[#allocation5 + $0x160] sm:$0xff]  ;;  %v120_v42 = vld [vmem:[#allocation5 + $0x168] sm:$0xff]  ;;  %v1088_v44 = vcombine.low %v108_v33, %v112_v34  ;;  %v97_v16 = vld [vmem:[#allocation5 + $0xb0] sm:$0xff]  ;;  %v1069_v21 = vcombine.high %v86_v10, %v90_v11  ;;  %v1066_v22 = vcombine.low %v85_v6, %v89_v7  ;;  %v1068_v25 = vcombine.low %v86_v10, %v90_v11 }
  0x56   :  { %v1095_v45 = vcombine.high %v115_v39, %v119_v40  ;;  %v1097_v46 = vcombine.high %v116_v41, %v120_v42  ;;  %v123_v47 = vld [vmem:[#allocation5 + $0x180] sm:$0xff]  ;;  %v124_v49 = vld [vmem:[#allocation5 + $0x188] sm:$0xff]  ;;  %v1094_v51 = vcombine.low %v115_v39, %v119_v40  ;;  %v1096_v53 = vcombine.low %v116_v41, %v120_v42  ;;  %v94_v19 = vld [vmem:[#allocation5 + $0x98] sm:$0xff] }
  0x57   :  { %506 = vmatpush1.bf16.msra.mxu0 %v1070_v27  ;;  %547 = vmatpush1.bf16.msra.mxu1 %v1072_v28  ;;  %v127_v48 = vld [vmem:[#allocation5 + $0x1a0] sm:$0xff]  ;;  %v128_v50 = vld [vmem:[#allocation5 + $0x1a8] sm:$0xff]  ;;  %v98_v20 = vld [vmem:[#allocation5 + $0xb8] sm:$0xff]  ;;  %v1075_v26 = vcombine.high %v93_v15, %v97_v16 }
  0x58   :  { %507 = vmatprep.subr.bf16.mxu0 %v1079_v29  ;;  %548 = vmatprep.subr.bf16.mxu1 %v1081_v30  ;;  %v131_v52 = vld [vmem:[#allocation5 + $0x1c0] sm:$0xff]  ;;  %v1103_v54 = vcombine.high %v123_v47, %v127_v48  ;;  %v132_v56 = vld [vmem:[#allocation5 + $0x1c8] sm:$0xff]  ;;  %v1105_v58 = vcombine.high %v124_v49, %v128_v50  ;;  %v1102_v59 = vcombine.low %v123_v47, %v127_v48  ;;  %v101_v23 = vld [vmem:[#allocation5 + $0xd0] sm:$0xff] }
  0x59   :  { %v135_v55 = vld [vmem:[#allocation5 + $0x1e0] sm:$0xff]  ;;  %v136_v57 = vld [vmem:[#allocation5 + $0x1e8] sm:$0xff]  ;;  %v1104_v62 = vcombine.low %v124_v49, %v128_v50  ;;  %v105_v24 = vld [vmem:[#allocation5 + $0xf0] sm:$0xff]  ;;  %v1077_v29 = vcombine.high %v94_v19, %v98_v20  ;;  %v1074_v30 = vcombine.low %v93_v15, %v97_v16  ;;  %v1076_v33 = vcombine.low %v94_v19, %v98_v20 }
  0x5a   :  { %v1111_v63 = vcombine.high %v131_v52, %v135_v55  ;;  %v1113_v3 = vcombine.high %v132_v56, %v136_v57  ;;  %v1110_v5 = vcombine.low %v131_v52, %v135_v55  ;;  %v1112_v8 = vcombine.low %v132_v56, %v136_v57  ;;  %v102_v27 = vld [vmem:[#allocation5 + $0xd8] sm:$0xff]  ;;  %v109_v31 = vld [vmem:[#allocation5 + $0x110] sm:$0xff]  ;;  %v1205_v4 = vld [vmem:[#allocation8 + $0x40] sm:$0xff]  }
  0x5b   :  { %508 = vmatpush1.bf16.msra.mxu0 %v1078_v35  ;;  %549 = vmatpush1.bf16.msra.mxu1 %v1080_v36  ;;  %v106_v28 = vld [vmem:[#allocation5 + $0xf8] sm:$0xff]  ;;  %v113_v32 = vld [vmem:[#allocation5 + $0x130] sm:$0xff]  ;;  %v1083_v34 = vcombine.high %v101_v23, %v105_v24  ;;  %v1207_v6 = vld [vmem:[#allocation8] sm:$0xff]  }
  0x5c   :  { %509 = vmatprep.subr.bf16.mxu0 %v1087_v37  ;;  %550 = vmatprep.subr.bf16.mxu1 %v1089_v38  ;;  %v1085_v35 = vcombine.high %v102_v27, %v106_v28  ;;  %v110_v36 = vld [vmem:[#allocation5 + $0x118] sm:$0xff]  ;;  %v1082_v38 = vcombine.low %v101_v23, %v105_v24  ;;  %v1084_v39 = vcombine.low %v102_v27, %v106_v28  ;;  %v117_v41 = vld [vmem:[#allocation5 + $0x150] sm:$0xff]  ;;  %v1208_v7 = vld [vmem:[#allocation8 + $0x80] sm:$0xff]  }
  0x5d   :  { %v114_v37 = vld [vmem:[#allocation5 + $0x138] sm:$0xff]  ;;  %v1091_v40 = vcombine.high %v109_v31, %v113_v32  ;;  %v121_v42 = vld [vmem:[#allocation5 + $0x170] sm:$0xff]  ;;  %v1217_v16 = vld [vmem:[#allocation8 + $0x58] sm:$0xff]  }
  0x5e   :  { %v1099_v47 = vcombine.high %v117_v41, %v121_v42  ;;  %v125_v49 = vld [vmem:[#allocation5 + $0x190] sm:$0xff]  ;;  %v130_v52 = vld [vmem:[#allocation5 + $0x1b8] sm:$0xff]  ;;  %v1220_v19 = vld [vmem:[#allocation8 + $0x98] sm:$0xff]  }
  0x5f   :  { %510 = vmatpush1.bf16.msra.mxu0 %v1086_v43  ;;  %551 = vmatpush1.bf16.msra.mxu1 %v1088_v44  ;;  %v118_v43 = vld [vmem:[#allocation5 + $0x158] sm:$0xff]  ;;  %v129_v50 = vld [vmem:[#allocation5 + $0x1b0] sm:$0xff]  ;;  %v1221_v20 = vld [vmem:[#allocation8 + $0x60] sm:$0xff]  }
  0x60   :  { %511 = vmatprep.subr.bf16.mxu0 %v1095_v45  ;;  %552 = vmatprep.subr.bf16.mxu1 %v1097_v46  ;;  %v122_v44 = vld [vmem:[#allocation5 + $0x178] sm:$0xff]  ;;  %v1090_v45 = vcombine.low %v109_v31, %v113_v32  ;;  %v1092_v46 = vcombine.low %v110_v36, %v114_v37  ;;  %v1107_v55 = vcombine.high %v125_v49, %v129_v50  ;;  %v133_v57 = vld [vmem:[#allocation5 + $0x1d0] sm:$0xff]  ;;  %v1224_v23 = vld [vmem:[#allocation8 + $0xa0] sm:$0xff]  }
  0x61   :  { %v1101_v48 = vcombine.high %v118_v43, %v122_v44  ;;  %v138_v60 = vld [vmem:[#allocation5 + $0x1f8] sm:$0xff]  ;;  %v1106_v61 = vcombine.low %v125_v49, %v129_v50  ;;  %v1211_v10 = vld [vmem:[#allocation8 + $0x8] sm:$0xff]   ;;  %v1233_v32 = vld [vmem:[#allocation8 + $0x78] sm:$0xff]  }
  0x62   :  { %v1212_v11 = vld [vmem:[#allocation8 + $0x88] sm:$0xff]   ;;  %v1215_v15 = vld [vmem:[#allocation8 + $0x10] sm:$0xff]   ;;  %v139_v49 = vld [vmem:[#allocation7] sm:$0xff] }
  0x63   :  { %512 = vmatpush1.bf16.msra.mxu0 %v1094_v51  ;;  %553 = vmatpush1.bf16.msra.mxu1 %v1096_v53  ;;  %v126_v51 = vld [vmem:[#allocation5 + $0x198] sm:$0xff]  ;;  %v1098_v53 = vcombine.low %v117_v41, %v121_v42  ;;  %v1225_v24 = vld [vmem:[#allocation8 + $0x68] sm:$0xff]  }
  0x64   :  { %513 = vmatprep.subr.bf16.mxu0 %v1103_v54  ;;  %554 = vmatprep.subr.bf16.mxu1 %v1105_v58  ;;  %v1100_v54 = vcombine.low %v118_v43, %v122_v44  ;;  %v1109_v56 = vcombine.high %v126_v51, %v130_v52  ;;  %v137_v58 = vld [vmem:[#allocation5 + $0x1f0] sm:$0xff]  ;;  %v1229_v28 = vld [vmem:[#allocation8 + $0x70] sm:$0xff]   ;;  %v141_v43 = vlaneseq }
  0x65   :  { %v1114_v2 = vcombine.low %v133_v57, %v137_v58  ;;  %v1228_v27 = vld [vmem:[#allocation8 + $0xa8] sm:$0xff]   ;;  %v1232_v31 = vld [vmem:[#allocation8 + $0xb0] sm:$0xff]  }
  0x66   :  { %v142_v44 = vshrl.u32 %v141_v43, 7 }
  0x67   :  { %514 = vmatpush1.bf16.msra.mxu0 %v1102_v59  ;;  %555 = vmatpush1.bf16.msra.mxu1 %v1104_v62  ;;  %v134_v59 = vld [vmem:[#allocation5 + $0x1d8] sm:$0xff]  ;;  %v1108_v62 = vcombine.low %v126_v51, %v130_v52 }
  0x68   :  { %515 = vmatprep.subr.bf16.mxu0 %v1111_v63  ;;  %556 = vmatprep.subr.bf16.mxu1 %v1113_v3  ;;  %v1115_v63 = vcombine.high %v133_v57, %v137_v58  ;;  %v1117_v1 = vcombine.high %v134_v59, %v138_v60  ;;  %v1116_v3 = vcombine.low %v134_v59, %v138_v60 }
  0x6b   :  { %516 = vmatpush1.bf16.msra.mxu0 %v1110_v5  ;;  %557 = vmatpush1.bf16.msra.mxu1 %v1112_v8  ;;  %v1206_v5 = vld [vmem:[#allocation8 + $0xc0] sm:$0xff]   ;;  %v1209_v8 = vld [vmem:[#allocation8 + $0x48] sm:$0xff]  }
  0x6c   :  { %583 = vmatprep.subr.bf16.mxu0 %v1059_v9  ;;  %624 = vmatprep.subr.bf16.mxu1 %v1061_v12  ;;  %v1210_v9 = vld [vmem:[#allocation8 + $0xc8] sm:$0xff]   ;;  %v1213_v12 = vld [vmem:[#allocation8 + $0x50] sm:$0xff]  }
  0x6e   :  { %534 = vmatmul.mubr.bf16.vlgmr.msra.gmra.mrb[0].mxu0 %v1453_v13  ;;  %575 = vmatmul.mubr.bf16.vlgmr.msra.gmra.mrb[0].mxu1 %v1453_v13 }
  0x6f   :  { %584 = vmatpush1.bf16.msra.mxu0 %v1058_v14  ;;  %625 = vmatpush1.bf16.msra.mxu1 %v1060_v17  ;;  %v1214_v14 = vld [vmem:[#allocation8 + $0xd0] sm:$0xff]   ;;  %v1218_v17 = vld [vmem:[#allocation8 + $0xd8] sm:$0xff]  }
  0x70   :  { %585 = vmatprep.subr.bf16.mxu0 %v1067_v18  ;;  %626 = vmatprep.subr.bf16.mxu1 %v1069_v21  ;;  %v1219_v18 = vld [vmem:[#allocation8 + $0x18] sm:$0xff]   ;;  %v1222_v21 = vld [vmem:[#allocation8 + $0xe0] sm:$0xff]  }
  0x71   :  { %615 = vmatprep.mubr.bf16.mxu0 %v1371_v0  ;;  %656 = vmatprep.mubr.bf16.mxu1 %v1371_v0  ;;  %v1093_v0 = vcombine.high %v110_v36, %v114_v37 }
  0x73   :  { %586 = vmatpush1.bf16.msra.mxu0 %v1066_v22  ;;  %627 = vmatpush1.bf16.msra.mxu1 %v1068_v25  ;;  %v1223_v22 = vld [vmem:[#allocation8 + $0x20] sm:$0xff]   ;;  %v1226_v25 = vld [vmem:[#allocation8 + $0xe8] sm:$0xff]  }
  0x74   :  { %587 = vmatprep.subr.bf16.mxu0 %v1075_v26  ;;  %628 = vmatprep.subr.bf16.mxu1 %v1077_v29  ;;  %v1227_v26 = vld [vmem:[#allocation8 + $0x28] sm:$0xff]   ;;  %v1230_v29 = vld [vmem:[#allocation8 + $0xf0] sm:$0xff]  }
  0x77   :  { %588 = vmatpush1.bf16.msra.mxu0 %v1074_v30  ;;  %629 = vmatpush1.bf16.msra.mxu1 %v1076_v33  ;;  %v1231_v30 = vld [vmem:[#allocation8 + $0x30] sm:$0xff]   ;;  %v1234_v33 = vld [vmem:[#allocation8 + $0xf8] sm:$0xff]  }
  0x78   :  { %589 = vmatprep.subr.bf16.mxu0 %v1083_v34  ;;  %630 = vmatprep.subr.bf16.mxu1 %v1085_v35  ;;  %v1235_v34 = vld [vmem:[#allocation8 + $0x38] sm:$0xff]  }
  0x79   :  { %v1236_v35 = vld [vmem:[#allocation8 + $0xb8] sm:$0xff]  }
  0x7b   :  { %590 = vmatpush1.bf16.msra.mxu0 %v1082_v38  ;;  %631 = vmatpush1.bf16.msra.mxu1 %v1084_v39 }
  0x7c   :  { %591 = vmatprep.subr.bf16.mxu0 %v1091_v40  ;;  %632 = vmatprep.subr.bf16.mxu1 %v1093_v0 }
  0x7f   :  { %592 = vmatpush1.bf16.msra.mxu0 %v1090_v45  ;;  %633 = vmatpush1.bf16.msra.mxu1 %v1092_v46  ;;  %v159_v45 = vsub.s32 4, %v142_v44  ;;  %v167_v46 = vsub.s32 6, %v142_v44 }
  0x80   :  { %593 = vmatprep.subr.bf16.mxu0 %v1099_v47  ;;  %634 = vmatprep.subr.bf16.mxu1 %v1101_v48  ;;  %v163_v47 = vsub.s32 5, %v142_v44  ;;  %v171_v48 = vsub.s32 7, %v142_v44 }
  0x81   :  { %v160_v50 = vrot.slane %v139_v49, %v159_v45  ;;  %v168_v51 = vrot.slane %v139_v49, %v167_v46 }
  0x82   :  { %v164_v52 = vrot.slane %v139_v49, %v163_v47 }
  0x83   :  { %594 = vmatpush1.bf16.msra.mxu0 %v1098_v53  ;;  %635 = vmatpush1.bf16.msra.mxu1 %v1100_v54  ;;  %v172_v53 = vrot.slane %v139_v49, %v171_v48 }
  0x84   :  { %595 = vmatprep.subr.bf16.mxu0 %v1107_v55  ;;  %636 = vmatprep.subr.bf16.mxu1 %v1109_v56 }
  0x87   :  { %596 = vmatpush1.bf16.msra.mxu0 %v1106_v61  ;;  %637 = vmatpush1.bf16.msra.mxu1 %v1108_v62 }
  0x88   :  { %597 = vmatprep.subr.bf16.mxu0 %v1115_v63  ;;  %638 = vmatprep.subr.bf16.mxu1 %v1117_v1 }
  0x8b   :  { %598 = vmatpush1.bf16.msra.mxu0 %v1114_v2  ;;  %639 = vmatpush1.bf16.msra.mxu1 %v1116_v3 }
  0x8c   :  { %1151 = vmatprep.subr.bf16.mxu0 %v1205_v4  ;;  %1173 = vmatprep.subr.bf16.mxu1 %v1206_v5 }
  0x8e   :  { %616 = vmatmul.mubr.bf16.vlgmr.msra.gmra.mrb[4].mxu0 %v1453_v13  ;;  %657 = vmatmul.mubr.bf16.vlgmr.msra.gmra.mrb[4].mxu1 %v1453_v13  ;;  %v1216_v13 = vld [vmem:[#allocation8 + $0x90] sm:$0xff]  }
  0x8f   :  { %1152 = vmatpush3.bf16.msra.mxu0 %v1207_v6  ;;  %1174 = vmatpush3.bf16.msra.mxu1 %v1208_v7  ;;  %v143_v7 = vsub.s32 0, %v142_v44 }
  0x90   :  { %1153 = vmatprep.subr.bf16.mxu0 %v1209_v8  ;;  %1175 = vmatprep.subr.bf16.mxu1 %v1210_v9  ;;  %v151_v8 = vsub.s32 2, %v142_v44  ;;  %v147_v9 = vsub.s32 1, %v142_v44 }
  0x93   :  { %1154 = vmatpush3.bf16.msra.mxu0 %v1211_v10  ;;  %1176 = vmatpush3.bf16.msra.mxu1 %v1212_v11  ;;  %v155_v10 = vsub.s32 3, %v142_v44  ;;  %v144_v11 = vrot.slane %v139_v49, %v143_v7 }
  0x94   :  { %1155 = vmatprep.subr.bf16.mxu0 %v1213_v12  ;;  %1177 = vmatprep.subr.bf16.mxu1 %v1214_v14  ;;  %v152_v14 = vrot.slane %v139_v49, %v151_v8 }
  0x97   :  { %1156 = vmatpush3.bf16.msra.mxu0 %v1215_v15  ;;  %1178 = vmatpush3.bf16.msra.mxu1 %v1216_v13  ;;  %v148_v13 = vrot.slane %v139_v49, %v147_v9 }
  0x98   :  { %1157 = vmatprep.subr.bf16.mxu0 %v1217_v16  ;;  %1179 = vmatprep.subr.bf16.mxu1 %v1218_v17 }
  0x9b   :  { %1158 = vmatpush3.bf16.msra.mxu0 %v1219_v18  ;;  %1180 = vmatpush3.bf16.msra.mxu1 %v1220_v19  ;;  %v156_v19 = vrot.slane %v139_v49, %v155_v10 }
  0x9c   :  { %1159 = vmatprep.subr.bf16.mxu0 %v1221_v20  ;;  %1181 = vmatprep.subr.bf16.mxu1 %v1222_v21 }
  0x9f   :  { %1160 = vmatpush3.bf16.msra.mxu0 %v1223_v22  ;;  %1182 = vmatpush3.bf16.msra.mxu1 %v1224_v23 }
  0xa0   :  { %1161 = vmatprep.subr.bf16.mxu0 %v1225_v24  ;;  %1183 = vmatprep.subr.bf16.mxu1 %v1226_v25 }
  0xa3   :  { %1162 = vmatpush3.bf16.msra.mxu0 %v1227_v26  ;;  %1184 = vmatpush3.bf16.msra.mxu1 %v1228_v27 }
  0xa4   :  { %1163 = vmatprep.subr.bf16.mxu0 %v1229_v28  ;;  %1185 = vmatprep.subr.bf16.mxu1 %v1230_v29 }
  0xa7   :  { %1164 = vmatpush3.bf16.msra.mxu0 %v1231_v30  ;;  %1186 = vmatpush3.bf16.msra.mxu1 %v1232_v31 }
  0xa8   :  { %1165 = vmatprep.subr.bf16.mxu0 %v1233_v32  ;;  %1187 = vmatprep.subr.bf16.mxu1 %v1234_v33 }
  0xab   :  { %1166 = vmatpush3.bf16.msra.mxu0 %v1235_v34  ;;  %1188 = vmatpush3.bf16.msra.mxu1 %v1236_v35 }
 0x141   :  { %v535_v36 = vpop.f32.mrb[0].mxu0  ;;  %v576_v37 = vpop.f32.mrb[0].mxu1 }
 0x142   :  { %v537_v38 = vpop.f32.mrb[1].mxu0  ;;  %v1461_v39 = vpop.f32.mrb[1].mxu1  ;;  %v536_v23 = vadd.f32 %v535_v36, %v144_v11  ;;  %v577_v27 = vadd.f32 %v576_v37, %v152_v14 }
 0x143   :  { %v539_v40 = vpop.f32.mrb[2].mxu0  ;;  %v580_v0 = vpop.f32.mrb[2].mxu1  ;;  %v538_v31 = vadd.f32 %v537_v38, %v148_v13  ;;  %v579_v34 = vadd.f32 %v1461_v39, %v156_v19  ;;  %v1118_v38 = vld [vmem:[%s1483_s4] ss:$0 sm:$0xff] }
 0x144   :  { %v540_v41 = vpop.f32.mrb[3].mxu0  ;;  %v581_v42 = vpop.f32.mrb[3].mxu1 }
 0x161   :  { %v617_v54 = vpop.f32.mrb[4].mxu0  ;;  %v658_v56 = vpop.f32.mrb[4].mxu1 }
 0x162   :  { %v618_v55 = vadd.f32 %v617_v54, %v160_v50  ;;  %v619_v57 = vpop.f32.mrb[5].mxu0  ;;  %v659_v58 = vadd.f32 %v658_v56, %v168_v51  ;;  %v660_v60 = vpop.f32.mrb[5].mxu1 }
 0x163   :  { %v620_v59 = vadd.f32 %v619_v57, %v164_v52  ;;  %v621_v61 = vpop.f32.mrb[6].mxu0  ;;  %v661_v63 = vadd.f32 %v660_v60, %v172_v53  ;;  %v662_v1 = vpop.f32.mrb[6].mxu1 }
 0x164   :  { %v669_v62 = vmul.f32 0.70710677, %v618_v55  ;;  %v622_v2 = vpop.f32.mrb[7].mxu0  ;;  %v671_v3 = vmul.f32 0.70710677, %v659_v58  ;;  %v663_v6 = vpop.f32.mrb[7].mxu1 }
 0x165   :  { %v670_v4 = vmul.f32 0.70710677, %v620_v59  ;;  %v672_v5 = vmul.f32 0.70710677, %v661_v63  ;;  %v665_v16 = vmul.f32 0.5, %v618_v55  ;;  %v667_v20 = vmul.f32 0.5, %v659_v58 }
 0x166   :  { %1237 = verf.f32 %v669_v62  ;;  %v666_v25 = vmul.f32 0.5, %v620_v59  ;;  %v668_v29 = vmul.f32 0.5, %v661_v63 }
 0x167   :  { %1239 = verf.f32 %v671_v3 }
 0x168   :  { %1241 = verf.f32 %v670_v4 }
 0x169   :  { %1243 = verf.f32 %v672_v5 }
 0x170   :  { %v1238_v12 = vpop.eup %1237 }
 0x171   :  { %v1240_v15 = vpop.eup %1239  ;;  %v677_v17 = vadd.f32 1.0, %v1238_v12 }
 0x172   :  { %v1242_v18 = vpop.eup %1241  ;;  %v679_v21 = vadd.f32 1.0, %v1240_v15 }
 0x173   :  { %v1244_v22 = vpop.eup %1243  ;;  %v681_v24 = vmul.f32 %v677_v17, %v665_v16  ;;  %v678_v26 = vadd.f32 1.0, %v1242_v18 }
 0x174   :  { %v683_v28 = vmul.f32 %v679_v21, %v667_v20  ;;  %v680_v30 = vadd.f32 1.0, %v1244_v22 }
 0x175   :  { %v685_v32 = vmul.f32 %v681_v24, %v536_v23  ;;  %v682_v33 = vmul.f32 %v678_v26, %v666_v25 }
 0x176   :  { %v687_v35 = vmul.f32 %v683_v28, %v577_v27  ;;  %v684_v40 = vmul.f32 %v680_v30, %v668_v29 }
 0x177   :  { %v686_v0 = vmul.f32 %v682_v33, %v538_v31  ;;  %v689_v43 = vpack.c.bf16 %v685_v32, %v685_v32 }
 0x178   :  { %v688_v41 = vmul.f32 %v684_v40, %v579_v34  ;;  %v691_v36 = vpack.c.bf16 %v687_v35, %v687_v35 }
 0x179   :  { %v690_v42 = vpack.c.bf16 %v686_v0, %v686_v0 }
 0x17a   :  { %v692_v44 = vpack.c.bf16 %v688_v41, %v688_v41 }
 0x17b   :  { %988 = vmatprep.mubr.bf16.mxu0 %v690_v42 }
 0x17c   :  { %1028 = vmatprep.mubr.bf16.mxu1 %v692_v44  ;;  %989 = vmatmul.mubr.bf16.vlgmr.msra.gmra.mrb[8].mxu0 %v689_v43 }
 0x17d   :  { %1029 = vmatmul.mubr.bf16.vlgmr.msra.gmra.mrb[8].mxu1 %v691_v36 }
 0x24f   :  { %v1167_v37 = vpop.f32.mrb[8].mxu0 }
 0x250   :  { %v1189_v45 = vpop.f32.mrb[8].mxu1  ;;  %v1168_v46 = vpop.f32.mrb[9].mxu0 }
 0x251   :  { %v1169_v39 = vadd.f32 %v1168_v46, %v1167_v37  ;;  %v1190_v47 = vpop.f32.mrb[9].mxu1  ;;  %v1170_v48 = vpop.f32.mrb[10].mxu0 }
 0x252   :  { %v1191_v49 = vadd.f32 %v1190_v47, %v1189_v45  ;;  %v1192_v50 = vpop.f32.mrb[10].mxu1  ;;  %v1171_v51 = vpop.f32.mrb[11].mxu0 }
 0x253   :  { %v991_v52 = vadd.f32 %v1169_v39, %v1118_v38  ;;  %v1193_v53 = vpop.f32.mrb[11].mxu1 }
 0x255   :  { %v1031_v54 = vadd.f32 %v1191_v49, %v991_v52 }
 0x257   :  { %1036 = vst [vmem:[#allocation10] sm:$0xff] %v1031_v54 }
 0x258   :  { %1344 = shalt.err (!%p1341_p8)
}
 0x259   :  { %s1345_s21 = scalar_lea.hbm %s1484_s5, 128 }
 0x25a   :  { %p1346_p9 = scmp.ne.s32.totalorder %s1484_s5, %s1345_s21  ;;  %p1349_p10 = scmp.lt.u32.totalorder %s1345_s21, %s1484_s5 }
 0x25c   :  { %p1351_p11 = pnand %p1349_p10, %p1346_p9 }
 0x25e   :  { %1354 = shalt.err (!%p1351_p11)
}
 0x25f   :  { %1046 = dma.vmem_to_hbm [thread:$0]  %s1044_s18, 128, %s1484_s5, [#allocation4]  }
 0x260   :  { %1361 = dma.done.wait [#allocation4], 128  }
 0x261   :  { %1362 = vsyncadd [#allocation4], 4294967168 }
 0x262   :  { %1050 = vsyncpa [#allocation3], 1 }
 0x263   :  { %1051 = vsyncpa [#allocation6], 1 }
 0x264   :  { %1052 = vsyncpa [#allocation9], 1 }
 0x265   :  { %1053 = vsyncpa [#allocation4], 1 }

</bundles_post_ra>
